<compile_context>
chip_gen: v5e
topology: v5e:2x2
jax: 0.10.0
libtpu: 0.0.40
codegen_flags: <defaults>
</compile_context>

<pallas_src>
import functools

import jax
import jax.numpy as jnp
from jax.experimental import pallas as pl
from jax.experimental.pallas import tpu as pltpu


def _distill_kernel(s_ref, t_ref, lab_ref, out_ref, *,
                    temperature, vocab, seq_len, tile_s, mask_rows):
    i = pl.program_id(1)
    inv_t = 1.0 / float(temperature)

    # T-scaled student logits directly (unscaled student never materialized).
    s_t = s_ref[...].astype(jnp.float32) * inv_t            # [TR, V]
    t_blk = t_ref[...]
    if t_blk.shape[-1] != vocab:                             # teacher vocab window
        t_blk = t_blk[:, :vocab]                             # <=127 tail cols, in-VMEM
    t_t = t_blk.astype(jnp.float32) * inv_t                  # [TR, V]
    lab = lab_ref[...]                                        # [TR, 1] int32

    # ---- T-scaled student log-softmax pieces ---------------------------------
    s_max = jnp.max(s_t, axis=-1, keepdims=True)
    s_shift = s_t - s_max                                     # [TR, V]
    e_s = jnp.exp(s_shift)
    s_lse = jnp.log(jnp.sum(e_s, axis=-1, keepdims=True))

    # ---- T-scaled teacher softmax pieces (divide deferred) -------------------
    t_max = jnp.max(t_t, axis=-1, keepdims=True)
    t_shift = t_t - t_max
    e_t = jnp.exp(t_shift)
    t_sum = jnp.sum(e_t, axis=-1, keepdims=True)
    log_t_sum = jnp.log(t_sum)

    # KL rows with the per-row scalar hoisted out of the [TR, V] pass:
    #   sum(q*(log q - log p)) = sum(e_t*(t_shift - s_shift))/t_sum + (s_lse - log_t_sum)
    kl_dot = jnp.sum(e_t * (t_shift - s_shift), axis=-1, keepdims=True)
    kl_rows = kl_dot * pl.reciprocal(t_sum) + (s_lse - log_t_sum)

    # ---- hard loss: cross_entropy(student_logits, labels, ignore_index=-100) -
    # From s_shift only (the unscaled row max cancels):
    #   nll = log(sum(exp(T * s_shift))) - T * s_shift[label]
    tf = float(temperature)
    if tf == 1.0:
        e_ns = e_s
    elif tf == 2.0:
        e_ns = e_s * e_s            # one VALU mul replaces one EUP exp: free for T==2
    else:
        e_ns = jnp.exp(s_shift * tf)  # EUP has slack; keep the VALU slot light
    r_lse = jnp.log(jnp.sum(e_ns, axis=-1, keepdims=True))

    vocab_ids = jax.lax.broadcasted_iota(jnp.int32, s_shift.shape, 1)
    picked_shift = jnp.sum(jnp.where(vocab_ids == lab, s_shift, 0.0),
                           axis=-1, keepdims=True)            # s_shift[row, label]
    valid = lab != -100

    if mask_rows:  # ragged S: rows beyond seq_len in the last block contribute nothing
        row_ids = jax.lax.broadcasted_iota(jnp.int32, (tile_s, 1), 0)
        in_range = (i * tile_s + row_ids) < seq_len
        kl_rows = jnp.where(in_range, kl_rows, 0.0)
        valid = jnp.logical_and(valid, in_range)

    hard_rows = jnp.where(valid, r_lse - tf * picked_shift, 0.0)

    soft_p = jnp.sum(kl_rows)
    hard_p = jnp.sum(hard_rows)
    cnt_p = jnp.sum(valid.astype(jnp.float32))

    rows = jax.lax.broadcasted_iota(jnp.int32, (8, 128), 0)
    out_ref[...] = jnp.where(rows == 0, soft_p,
                   jnp.where(rows == 1, hard_p,
                   jnp.where(rows == 2, cnt_p, 0.0)))


def distillation_loss(student_logits, teacher_logits, labels,
                      temperature=2.0, alpha=0.5):
    """Pallas implementation of DistillationLoss.forward (native-dtype inputs)."""
    B, S, V = student_logits.shape
    Bt, S_t, V_t = teacher_logits.shape
    assert Bt == B, "student/teacher batch mismatch"
    assert S_t >= S and V_t >= V, "teacher must cover the student window"

    # Teacher vocab window: DMA only ~V columns per row.  If V is 128-aligned
    # (or equal to V_t) the block is exactly V wide; otherwise round up to the
    # next lane multiple (<=127 extra columns) and slice in-kernel.
    if V == V_t or V % 128 == 0:
        t_bv = V
    else:
        t_bv = min(V_t, ((V + 127) // 128) * 128)

    # --- VMEM-budgeted row-tile selection (per-generation via get_tpu_info) ---
    try:
        info = pltpu.get_tpu_info()
        vmem_cap = int(getattr(info, "vmem_capacity_bytes", 64 * 2**20))
    except Exception:  # no TPU info available; assume the smallest (v7x) budget
        vmem_cap = 64 * 2**20
    vmem_cap = min(vmem_cap, 128 * 2**20)      # guard against a per-chip (2-TC) report
    vmem_limit = min(vmem_cap * 3 // 4, 100 * 2**20)
    budget = int(vmem_limit * 0.8)             # headroom for the compiler

    s_item = student_logits.dtype.itemsize
    t_item = teacher_logits.dtype.itemsize
    per_row = (2 * (V * s_item + t_bv * t_item + 4)   # double-buffered input blocks
               + 7 * 4 * max(V, t_bv)                 # ~7 live fp32 full-width temps
               + 256)                                 # per-row scalars / slack
    # TODO(synk): vocab-tiled online-LSE path when per_row * 8 > budget (huge V on v7x).
    s_pad8 = ((S + 7) // 8) * 8
    cap_rows = max(8, (budget // per_row) // 8 * 8)
    cap_rows = min(cap_rows, s_pad8)

    # Prefer an exact divisor of S (no in-kernel row mask); fall back to an
    # 8-aligned non-divisor tile with row masking for ragged / awkward S.
    best = 0
    for cand in range(min(S, cap_rows), 0, -1):
        if S % cand == 0 and (cand % 8 == 0 or (cand == S and S == S_t)):
            best = cand
            break
    if best == S or best >= max(8, cap_rows // 2):
        tile_s, mask_rows = best, False
    else:
        tile_s = cap_rows
        mask_rows = (S % tile_s != 0)
    n_blocks = -(-S // tile_s)

    lab3 = labels.reshape(B, S, 1).astype(jnp.int32)   # reshape is free (contiguous)

    kernel = functools.partial(
        _distill_kernel,
        temperature=float(temperature),
        vocab=V,
        seq_len=S,
        tile_s=tile_s,
        mask_rows=mask_rows,
    )

    parts = pl.pallas_call(
        kernel,
        out_shape=jax.ShapeDtypeStruct((B, n_blocks, 8, 128), jnp.float32),
        grid_spec=pltpu.PrefetchScalarGridSpec(
            num_scalar_prefetch=0,
            grid=(B, n_blocks),
            in_specs=[
                pl.BlockSpec((None, tile_s, V), lambda b, i: (b, i, 0)),
                pl.BlockSpec((None, tile_s, t_bv), lambda b, i: (b, i, 0)),
                pl.BlockSpec((None, tile_s, 1), lambda b, i: (b, i, 0)),
            ],
            out_specs=pl.BlockSpec((None, None, 8, 128), lambda b, i: (b, i, 0, 0)),
        ),
        compiler_params=pltpu.CompilerParams(
            dimension_semantics=("parallel", "parallel"),
            vmem_limit_bytes=int(vmem_limit),
        ),
    )(student_logits, teacher_logits, lab3)

    soft_sum = jnp.sum(parts[:, :, 0, 0])
    hard_sum = jnp.sum(parts[:, :, 1, 0])
    cnt = jnp.sum(parts[:, :, 2, 0])

    soft_loss = soft_sum / jnp.float32(B)   # KLDivLoss 'batchmean' on 3-D input -> / B
    hard_loss = hard_sum / cnt              # mean over non-ignored (NaN if none, like torch)
    return (alpha * soft_loss + (1.0 - alpha) * hard_loss).astype(jnp.float32)


def _reference(student_logits, teacher_logits, labels, temperature=2.0, alpha=0.5):
    """Pure-JAX reference mirroring the PyTorch module."""
    B, S, V = student_logits.shape
    t = teacher_logits[:, :S, :V]
    logp_s = jax.nn.log_softmax(student_logits / temperature, axis=-1)
    q = jax.nn.softmax(t / temperature, axis=-1)
    log_q = jax.nn.log_softmax(t / temperature, axis=-1)
    soft = jnp.sum(q * (log_q - logp_s)) / B
    logp = jax.nn.log_softmax(student_logits, axis=-1).reshape(-1, V)
    lab = labels.reshape(-1)
    valid = lab != -100
    safe_lab = jnp.where(valid, lab, 0)
    nll = -jnp.take_along_axis(logp, safe_lab[:, None], axis=-1)[:, 0]
    hard = jnp.sum(jnp.where(valid, nll, 0.0)) / jnp.sum(valid)
    return alpha * soft + (1 - alpha) * hard


if __name__ == "__main__":
    B, S, V = 2, 8, 32          # student: [batch, seq, vocab]
    S_t, V_t = 10, 40           # teacher may be larger; forward uses [:, :S, :V]

    key = jax.random.PRNGKey(0)
    k1, k2, k3 = jax.random.split(key, 3)
    student_logits = jax.random.normal(k1, (B, S, V), dtype=jnp.float32)
    teacher_logits = jax.random.normal(k2, (B, S_t, V_t), dtype=jnp.float32)
    labels = jax.random.randint(k3, (B, S), 0, V, dtype=jnp.int32)
    # mark a few positions as ignored (ignore_index = -100)
    labels = labels.at[0, 0].set(-100).at[1, 3].set(-100)

    loss = distillation_loss(student_logits, teacher_logits, labels,
                             temperature=2.0, alpha=0.5)
    loss = jax.block_until_ready(loss)

    ref = _reference(student_logits, teacher_logits, labels, 2.0, 0.5)
    assert jnp.allclose(loss, ref, rtol=1e-5, atol=1e-5), (loss, ref)

    print("KERNEL_OK")
</pallas_src>

<mosaic_0001>
module attributes {stable_mosaic.version = 11 : i64} {
  func.func @_distill_kernel(%arg0: i32, %arg1: i32, %arg2: memref<1x8x32xf32, #tpu.memory_space<vmem>>, %arg3: memref<1x8x40xf32, #tpu.memory_space<vmem>>, %arg4: memref<1x8x1xi32, #tpu.memory_space<vmem>>, %arg5: memref<1x1x8x128xf32, #tpu.memory_space<vmem>>) attributes {dimension_semantics = [#tpu.dimension_semantics<parallel>, #tpu.dimension_semantics<parallel>], iteration_bounds = array<i64: 2, 1>, scalar_prefetch = 0 : i64, scratch_operands = 0 : i64, tpu.core_type = #tpu.core_type<tc>, window_params = [{transform_indices = @transform_0, window_bounds = array<i64: 1, 8, 32>}, {transform_indices = @transform_1, window_bounds = array<i64: 1, 8, 40>}, {transform_indices = @transform_2, window_bounds = array<i64: 1, 8, 1>}, {transform_indices = @transform_3, window_bounds = array<i64: 1, 1, 8, 128>}]} {
    %c0 = arith.constant 0 : index
    %c0_0 = arith.constant 0 : index
    %c0_1 = arith.constant 0 : index
    %0 = vector.load %arg2[%c0, %c0_0, %c0_1] : memref<1x8x32xf32, #tpu.memory_space<vmem>>, vector<1x8x32xf32>
    %1 = vector.shape_cast %0 : vector<1x8x32xf32> to vector<8x32xf32>
    %cst = arith.constant 5.000000e-01 : f32
    %2 = vector.broadcast %cst : f32 to vector<8x32xf32>
    %3 = arith.mulf %1, %2 : vector<8x32xf32>
    %c0_2 = arith.constant 0 : index
    %c0_3 = arith.constant 0 : index
    %c0_4 = arith.constant 0 : index
    %4 = vector.load %arg3[%c0_2, %c0_3, %c0_4] : memref<1x8x40xf32, #tpu.memory_space<vmem>>, vector<1x8x40xf32>
    %5 = vector.shape_cast %4 : vector<1x8x40xf32> to vector<8x40xf32>
    %6 = vector.extract_strided_slice %5 {offsets = [0, 0], sizes = [8, 32], strides = [1, 1]} : vector<8x40xf32> to vector<8x32xf32>
    %cst_5 = arith.constant 5.000000e-01 : f32
    %7 = vector.broadcast %cst_5 : f32 to vector<8x32xf32>
    %8 = arith.mulf %6, %7 : vector<8x32xf32>
    %c0_6 = arith.constant 0 : index
    %c0_7 = arith.constant 0 : index
    %c0_8 = arith.constant 0 : index
    %9 = vector.load %arg4[%c0_6, %c0_7, %c0_8] : memref<1x8x1xi32, #tpu.memory_space<vmem>>, vector<1x8x1xi32>
    %10 = vector.shape_cast %9 : vector<1x8x1xi32> to vector<8x1xi32>
    %cst_9 = arith.constant dense<0xFF800000> : vector<8xf32>
    %11 = vector.multi_reduction <maximumf>, %3, %cst_9 [1] : vector<8x32xf32> to vector<8xf32>
    %12 = vector.shape_cast %11 : vector<8xf32> to vector<8x1xf32>
    %13 = vector.broadcast %12 : vector<8x1xf32> to vector<8x32xf32>
    %14 = arith.subf %3, %13 : vector<8x32xf32>
    %15 = math.exp %14 : vector<8x32xf32>
    %cst_10 = arith.constant dense<0.000000e+00> : vector<8xf32>
    %16 = vector.multi_reduction <add>, %15, %cst_10 [1] : vector<8x32xf32> to vector<8xf32>
    %17 = vector.shape_cast %16 : vector<8xf32> to vector<8x1xf32>
    %18 = math.log %17 : vector<8x1xf32>
    %cst_11 = arith.constant dense<0xFF800000> : vector<8xf32>
    %19 = vector.multi_reduction <maximumf>, %8, %cst_11 [1] : vector<8x32xf32> to vector<8xf32>
    %20 = vector.shape_cast %19 : vector<8xf32> to vector<8x1xf32>
    %21 = vector.broadcast %20 : vector<8x1xf32> to vector<8x32xf32>
    %22 = arith.subf %8, %21 : vector<8x32xf32>
    %23 = math.exp %22 : vector<8x32xf32>
    %cst_12 = arith.constant dense<0.000000e+00> : vector<8xf32>
    %24 = vector.multi_reduction <add>, %23, %cst_12 [1] : vector<8x32xf32> to vector<8xf32>
    %25 = vector.shape_cast %24 : vector<8xf32> to vector<8x1xf32>
    %26 = math.log %25 : vector<8x1xf32>
    %27 = arith.subf %22, %14 : vector<8x32xf32>
    %28 = arith.mulf %23, %27 : vector<8x32xf32>
    %cst_13 = arith.constant dense<0.000000e+00> : vector<8xf32>
    %29 = vector.multi_reduction <add>, %28, %cst_13 [1] : vector<8x32xf32> to vector<8xf32>
    %30 = vector.shape_cast %29 : vector<8xf32> to vector<8x1xf32>
    %31 = tpu.reciprocal %25 : vector<8x1xf32> -> vector<8x1xf32>
    %32 = arith.mulf %30, %31 : vector<8x1xf32>
    %33 = arith.subf %18, %26 : vector<8x1xf32>
    %34 = arith.addf %32, %33 : vector<8x1xf32>
    %35 = arith.mulf %15, %15 : vector<8x32xf32>
    %cst_14 = arith.constant dense<0.000000e+00> : vector<8xf32>
    %36 = vector.multi_reduction <add>, %35, %cst_14 [1] : vector<8x32xf32> to vector<8xf32>
    %37 = vector.shape_cast %36 : vector<8xf32> to vector<8x1xf32>
    %38 = math.log %37 : vector<8x1xf32>
    %39 = tpu.iota {dimensions = array<i32: 1>} : vector<8x32xi32>
    %40 = vector.broadcast %10 : vector<8x1xi32> to vector<8x32xi32>
    %41 = arith.cmpi eq, %39, %40 : vector<8x32xi32>
    %cst_15 = arith.constant 0.000000e+00 : f32
    %42 = vector.broadcast %cst_15 : f32 to vector<8x32xf32>
    %43 = arith.select %41, %14, %42 : vector<8x32xi1>, vector<8x32xf32>
    %cst_16 = arith.constant dense<0.000000e+00> : vector<8xf32>
    %44 = vector.multi_reduction <add>, %43, %cst_16 [1] : vector<8x32xf32> to vector<8xf32>
    %45 = vector.shape_cast %44 : vector<8xf32> to vector<8x1xf32>
    %c-100_i32 = arith.constant -100 : i32
    %46 = vector.broadcast %c-100_i32 : i32 to vector<8x1xi32>
    %47 = arith.cmpi ne, %10, %46 : vector<8x1xi32>
    %cst_17 = arith.constant 2.000000e+00 : f32
    %48 = vector.broadcast %cst_17 : f32 to vector<8x1xf32>
    %49 = arith.mulf %48, %45 : vector<8x1xf32>
    %50 = arith.subf %38, %49 : vector<8x1xf32>
    %cst_18 = arith.constant 0.000000e+00 : f32
    %51 = vector.broadcast %cst_18 : f32 to vector<8x1xf32>
    %52 = arith.select %47, %50, %51 : vector<8x1xi1>, vector<8x1xf32>
    %53 = vector.shape_cast %34 : vector<8x1xf32> to vector<1x8x1xf32>
    %cst_19 = arith.constant dense<0.000000e+00> : vector<1xf32>
    %54 = vector.multi_reduction <add>, %53, %cst_19 [1, 2] : vector<1x8x1xf32> to vector<1xf32>
    %55 = vector.shape_cast %54 : vector<1xf32> to vector<1x1x1xf32>
    %56 = vector.extract %55[0, 0, 0] : f32 from vector<1x1x1xf32>
    %57 = vector.shape_cast %52 : vector<8x1xf32> to vector<1x8x1xf32>
    %cst_20 = arith.constant dense<0.000000e+00> : vector<1xf32>
    %58 = vector.multi_reduction <add>, %57, %cst_20 [1, 2] : vector<1x8x1xf32> to vector<1xf32>
    %59 = vector.shape_cast %58 : vector<1xf32> to vector<1x1x1xf32>
    %60 = vector.extract %59[0, 0, 0] : f32 from vector<1x1x1xf32>
    %61 = arith.extui %47 : vector<8x1xi1> to vector<8x1xi32>
    %62 = arith.sitofp %61 : vector<8x1xi32> to vector<8x1xf32>
    %63 = vector.shape_cast %62 : vector<8x1xf32> to vector<1x8x1xf32>
    %cst_21 = arith.constant dense<0.000000e+00> : vector<1xf32>
    %64 = vector.multi_reduction <add>, %63, %cst_21 [1, 2] : vector<1x8x1xf32> to vector<1xf32>
    %65 = vector.shape_cast %64 : vector<1xf32> to vector<1x1x1xf32>
    %66 = vector.extract %65[0, 0, 0] : f32 from vector<1x1x1xf32>
    %67 = tpu.iota {dimensions = array<i32: 0>} : vector<8x128xi32>
    %c0_i32 = arith.constant 0 : i32
    %68 = vector.broadcast %c0_i32 : i32 to vector<8x128xi32>
    %69 = arith.cmpi eq, %67, %68 : vector<8x128xi32>
    %c1_i32 = arith.constant 1 : i32
    %70 = vector.broadcast %c1_i32 : i32 to vector<8x128xi32>
    %71 = arith.cmpi eq, %67, %70 : vector<8x128xi32>
    %c2_i32 = arith.constant 2 : i32
    %72 = vector.broadcast %c2_i32 : i32 to vector<8x128xi32>
    %73 = arith.cmpi eq, %67, %72 : vector<8x128xi32>
    %cst_22 = arith.constant 0.000000e+00 : f32
    %74 = vector.broadcast %66 : f32 to vector<8x128xf32>
    %75 = vector.broadcast %cst_22 : f32 to vector<8x128xf32>
    %76 = arith.select %73, %74, %75 : vector<8x128xi1>, vector<8x128xf32>
    %77 = vector.broadcast %60 : f32 to vector<8x128xf32>
    %78 = arith.select %71, %77, %76 : vector<8x128xi1>, vector<8x128xf32>
    %79 = vector.broadcast %56 : f32 to vector<8x128xf32>
    %80 = arith.select %69, %79, %78 : vector<8x128xi1>, vector<8x128xf32>
    %c0_23 = arith.constant 0 : index
    %c0_24 = arith.constant 0 : index
    %c0_25 = arith.constant 0 : index
    %c0_26 = arith.constant 0 : index
    %81 = vector.load %arg5[%c0_23, %c0_24, %c0_25, %c0_26] : memref<1x1x8x128xf32, #tpu.memory_space<vmem>>, vector<1x1x8x128xf32>
    %82 = vector.shape_cast %81 : vector<1x1x8x128xf32> to vector<8x128xf32>
    %83 = vector.shape_cast %80 : vector<8x128xf32> to vector<1x1x8x128xf32>
    tpu.vector_store %arg5[%c0_23, %c0_24, %c0_25, %c0_26], %83 {strides = array<i32>} : memref<1x1x8x128xf32, #tpu.memory_space<vmem>>, vector<1x1x8x128xf32>,
    return
  }
  func.func @transform_0(%arg0: i32, %arg1: i32) -> (i32, i32, i32) {
    %c0_i32 = arith.constant 0 : i32
    %c0_i32_0 = arith.constant 0 : i32
    return %arg0, %arg1, %c0_i32 : i32, i32, i32
  }
  func.func @transform_1(%arg0: i32, %arg1: i32) -> (i32, i32, i32) {
    %c0_i32 = arith.constant 0 : i32
    %c0_i32_0 = arith.constant 0 : i32
    return %arg0, %arg1, %c0_i32 : i32, i32, i32
  }
  func.func @transform_2(%arg0: i32, %arg1: i32) -> (i32, i32, i32) {
    %c0_i32 = arith.constant 0 : i32
    %c0_i32_0 = arith.constant 0 : i32
    return %arg0, %arg1, %c0_i32 : i32, i32, i32
  }
  func.func @transform_3(%arg0: i32, %arg1: i32) -> (i32, i32, i32, i32) {
    %c0_i32 = arith.constant 0 : i32
    %c0_i32_0 = arith.constant 0 : i32
    %c0_i32_1 = arith.constant 0 : i32
    return %arg0, %arg1, %c0_i32, %c0_i32_0 : i32, i32, i32, i32
  }
}

</mosaic_0001>

<bundles_post_ra>
// kernel: tpu_custom_call.1
= control target key start
LH: loop header
LB: loop body
LE: loop exit
PB: predicated region body
PF: predicated region fallthrough
CT: control target
= control target key end

     0   :  { %8 = vsyncpa [#allocation3], 0  ;;  %s800_s0 = inlined_call_operand.vmem [shape: f32[2,8,32], index: 0, kind: input, shape index: {}]   ;;  %s801_s1 = inlined_call_operand.vmem [shape: f32[2,10,40], index: 1, kind: input, shape index: {}]   ;;  %s802_s2 = inlined_call_operand.vmem [shape: s32[2,8,1], index: 2, kind: input, shape index: {}]   ;;  %s803_s3 = inlined_call_operand.hbm [shape: f32[2,1,8,128], index: 3, kind: output, shape index: {}]  }
   0x1   :  { %10 = vsyncpa [#allocation3 + $0x1], 0  ;;  %s681_s12 = smov 0   ;;  %s683_s13 = smov 0  }
   0x2   :  { %s685_s14 = smov 0   ;;  %s687_s15 = smov 0  }
   0x3   :  { %s689_s16 = smov 0   ;;  %s691_s17 = smov 0  }
   0x4 LB: > { %s486_s18 = sadd.s32 4294967295, %s657_s17   ;;  %s487_s19 = sadd.s32 4294967294, %s657_s17   ;;  %s657_s17 = sphi %s691_s17, %s16_s17   ;;  %s653_s16 = sphi %s689_s16, %s810_s16   ;;  %s649_s15 = sphi %s687_s15, %s809_s15   ;;  %s645_s14 = sphi %s685_s14, %s808_s14   ;;  %s641_s13 = sphi %s683_s13, %s807_s13   ;;  %s637_s12 = sphi %s681_s12, %s806_s12  }
   0x5   : > { %s28_s20 = sadd.s32 1, %s653_s16  ;;  %s121_s21 = sadd.s32 1, %s645_s14 }
   0x6   : > { %p30_p0 = scmp.ge.s32.totalorder %s28_s20, 2  ;;  %p131_p1 = scmp.ne.s32.totalorder %s645_s14, %s641_s13 }
   0x7   : > { %p132_p2 = scmp.eq.s32.totalorder %s486_s18, 1  ;;  %p137_p3 = scmp.ne.s32.totalorder %s641_s13, %s637_s12 }
   0x8   : > { %s812_s20 = smov (%p30_p0, %s28_s20), 0  ;;  %p138_p5 = scmp.eq.s32.totalorder %s487_s19, 1 }
   0x9   : > { %p721_p4 = por %p132_p2, %p131_p1  ;;  %s116_s23 = ssub.s32 %s653_s16, %s812_s20 }
   0xa   : > { %p490_p6 = scmp.ge.s32.totalorder %s657_s17, 1  ;;  %p119_p7 = scmp.eq.s32.totalorder %s116_s23, 0 }
   0xb   : > { %p728_p8 = por %p138_p5, %p137_p3  ;;  %p187_p9 = scmp.lt.s32.totalorder %s657_s17, 3 }
   0xc   : > { %s734_s25 = scalar_select %p119_p7, %s645_s14, %s121_s21  }
   0xd   : > { %p188_p10 = pnand %p490_p6, %p187_p9 }
   0xe   : > { %p228_p11 = scmp.lt.s32.totalorder (!%p188_p10), %s649_s15, 1  ;;  %s225_s11 = sand.u32 (!%p188_p10), 1, %s641_s13  }
   0xf   : > { %191 = sbr.rel (%p188_p10) target bundleno = 494 (0x1ee), region = 32  ;;  %s491_s18 = sshll.u32 (!%p188_p10), %s225_s11, 3 }
  0x10   : > { %s498_s19 = sshll.u32 (!%p188_p10), %s649_s15, 3  ;;  %s227_s29 = scalar_lea.vmem (!%p188_p10), [#allocation2], %s491_s18 }
  0x11   : > { %s765_s30 = sshll.u32 (!%p188_p10), %s227_s29, 4  ;;  %s380_s30 = int_to_ptr.vmem [resolvable:$true] %s765_s30 }
  0x14   : > { %v659_v0 = vmov 0   ;;  %s229_s26 = scalar_select %p228_p11, %s649_s15, 1  ;;  %vm255_vm0 = vcmask 261120   ;;  %v306_v9 = vlaneseq  ;;  %vm320_vm7 = vcmask 7168  }
  0x15   : > { %565 = vset.pattern.permute.xlu1 %v659_v0  ;;  %566 = vset.pattern.permute.xlu0 %v659_v0  ;;  %v660_v57 = vmov 0.0   ;;  %s366_s15 = scalar_lea.sflag [#allocation3], %s225_s11 }
  0x16   : > { %s501_s27 = sshll.u32 %s229_s26, 4  ;;  %s492_s28 = sshll.u32 %s229_s26, 3  ;;  %v307_v12 = vand.u32 127, %v306_v9 }
  0x17   : > { %s242_s4 = scalar_lea.vmem %s801_s1, %s501_s27  ;;  %s234_s7 = scalar_lea.vmem %s800_s0, %s492_s28 }
  0x18   : > { %v252_v1 = vld [vmem:[%s242_s4] sm:$0xff]  ;;  %s249_s10 = scalar_lea.vmem %s802_s2, %s492_s28  ;;  %s377_s27 = scalar_lea.hbm %s803_s3, %s498_s19 }
  0x19   : > { %v253_v2 = vmul.f32 0.5, %v252_v1  ;;  %v747_v3 = vld [vmem:[%s249_s10] sm:$0xff]  ;;  %s381_s5 = sshll.u32 %s377_s27, 4  ;;  %s599_s10 = scalar_lea.hbm %s803_s3, 16  ;;  %s382_s5 = int_to_ptr.hbm [resolvable:$true] %s381_s5 }
  0x1a   : > { %v250_v4 = vld [vmem:[%s234_s7] sm:$0xff]  ;;  %309 = vperm.xlu1 %565, %v747_v3   ;;  %vm316_vm6 = vcmp.ne.s32.totalorder %v747_v3, 4294967196  ;;  %s593_s6 = sshra.s32 %s382_s5, 4  ;;  %s594_s6 = int_to_ptr.hbm [resolvable:$true] %s593_s6 }
  0x1b   : > { %v267_v5 = vsel %vm255_vm0, %v253_v2, -inf  ;;  %v251_v6 = vmul.f32 0.5, %v250_v4  ;;  %v496_v58 = vsel %vm316_vm6, 1.0, %v660_v57  ;;  %s595_s7 = scalar_lea.hbm %s594_s6, 8  ;;  %p600_p1 = scmp.lt.s32.totalorder %s594_s6, %s803_s3 }
  0x1c   : > { %268 = vmax.xlane.f32.xlu0 %v267_v5  ;;  %v343_v59 = vsel %vm320_vm7, %v496_v58, 0.0  ;;  %p596_p12 = scmp.ne.s32.totalorder %s594_s6, %s595_s7  ;;  %p601_p2 = scmp.lt.s32.totalorder %s599_s10, %s595_s7 }
  0x1d   : > { %v256_v7 = vsel %vm255_vm0, %v251_v6, -inf }
  0x1e   : > { %p597_p13 = pnand %p596_p12, %p721_p4  ;;  %p602_p3 = por %p601_p2, %p600_p1 }
  0x20   : > { %p598_p0 = pneg %p597_p13 }
  0x22   : > { %p603_p5 = pnand %p602_p3, %p598_p0 }
  0x24   : > { %257 = vmax.xlane.f32.xlu0 %v256_v7 }
  0x8c   : > { %v310_v13 = vpop.permute.xlu1 %309 }
  0x8d   : > { %vm311_vm1 = vcmp.eq.s32.totalorder %v307_v12, %v310_v13 }
  0x8f   : > { %v269_v8 = vpop.xlane.xlu0 %268 }
  0x90   : > { %v270_v10 = vsub.f32 %v253_v2, %v269_v8 }
  0x92   : > { %v271_v11 = vmul.f32 1.442695, %v270_v10 }
  0x94   : > { %567 = vpow2.f32 %v271_v11 }
  0x97   : > { %v258_v14 = vpop.xlane.xlu0 %257 }
  0x98   : > { %v259_v15 = vsub.f32 %v251_v6, %v258_v14 }
  0x9a   : > { %v568_v16 = vpop.eup %567  ;;  %v260_v17 = vmul.f32 1.442695, %v259_v15  ;;  %v312_v18 = vsel %vm311_vm1, %v259_v15, 0.0  ;;  %v278_v25 = vsub.f32 %v270_v10, %v259_v15 }
  0x9b   : > { %v273_v19 = vsel %vm255_vm0, %v568_v16, 0.0  ;;  %v313_v20 = vsel %vm255_vm0, %v312_v18, 0.0  ;;  %v354_v18 = vshrl.u32 %v306_v9, 7 }
  0x9c   : > { %569 = vpow2.f32 %v260_v17  ;;  %274 = vadd.xlane.f32.xlu1 %v273_v19  ;;  %314 = vadd.xlane.f32.xlu0 %v313_v20  ;;  %v279_v26 = vmul.f32 %v568_v16, %v278_v25 }
  0x9d   : > { %vm357_vm8 = vcmp.eq.s32.totalorder %v354_v18, 2  ;;  %vm356_vm9 = vcmp.eq.s32.totalorder %v354_v18, 1  ;;  %vm355_vm10 = vcmp.eq.s32.totalorder %v354_v18, 0 }
  0x9e   : > { %v280_v27 = vsel %vm255_vm0, %v279_v26, 0.0 }
  0xa2   : > { %v570_v21 = vpop.eup %569 }
  0xa3   : > { %v262_v22 = vsel %vm255_vm0, %v570_v21, 0.0  ;;  %v300_v23 = vmul.f32 %v570_v21, %v570_v21 }
  0xa4   : > { %263 = vadd.xlane.f32.xlu2 %v262_v22 }
  0xa5   : > { %v301_v24 = vsel %vm255_vm0, %v300_v23, 0.0 }
  0xac   : > { %302 = vadd.xlane.f32.xlu2 %v301_v24 }
  0xb4   : > { %281 = vadd.xlane.f32.xlu2 %v280_v27 }
 0x10f   : > { %v275_v28 = vpop.xlane.xlu1 %274  ;;  %v315_v40 = vpop.xlane.xlu0 %314 }
 0x110   : > { %571 = vrcp.f32 %v275_v28  ;;  %v294_v37 = vand.u32 2147483648, %v275_v28  ;;  %vm288_vm3 = vweird.f32 %v275_v28  ;;  %v292_v38 = vand.u32 2147483647, %v275_v28 }
 0x111   : > { %v317_v46 = vmul.f32 2.0, %v315_v40 }
 0x112   : > { %v295_v43 = vor.u32 1.1754944e-38, %v294_v37  ;;  %vm293_vm5 = vcmp.eq.f32.partialorder %v292_v38, 8.507059e+37 }
 0x116   : > { %v572_v29 = vpop.eup %571 }
 0x117   : > { %v284_v30 = vmul.f32 %v572_v29, %v275_v28  ;;  %v264_v31 = vpop.xlane.xlu2 %263  ;;  %vm289_vm2 = vweird.f32 %v572_v29 }
 0x118   : > { %573 = vlog2.f32 %v264_v31  ;;  %vm290_vm4 = vmor %vm288_vm3, %vm289_vm2 }
 0x119   : > { %v285_v32 = vsub.f32 1.0, %v284_v30  ;;  %575 = vlog2.f32 %v275_v28 }
 0x11b   : > { %v286_v33 = vmul.f32 %v572_v29, %v285_v32 }
 0x11d   : > { %v287_v35 = vadd.f32 %v572_v29, %v286_v33 }
 0x11e   : > { %v574_v36 = vpop.eup %573 }
 0x11f   : > { %v303_v34 = vpop.xlane.xlu2 %302  ;;  %v576_v39 = vpop.eup %575  ;;  %v266_v41 = vmul.f32 0.6931472, %v574_v36  ;;  %v291_v42 = vsel %vm290_vm4, %v572_v29, %v287_v35 }
 0x120   : > { %577 = vlog2.f32 %v303_v34  ;;  %v277_v45 = vmul.f32 0.6931472, %v576_v39  ;;  %v296_v48 = vsel %vm293_vm5, %v295_v43, %v291_v42 }
 0x122   : > { %v298_v50 = vsub.f32 %v266_v41, %v277_v45 }
 0x126   : > { %v578_v44 = vpop.eup %577 }
 0x127   : > { %v305_v47 = vmul.f32 0.6931472, %v578_v44  ;;  %v282_v49 = vpop.xlane.xlu2 %281 }
 0x128   : > { %v297_v51 = vmul.f32 %v296_v48, %v282_v49 }
 0x129   : > { %v318_v52 = vsub.f32 %v305_v47, %v317_v46 }
 0x12a   : > { %v299_v53 = vadd.f32 %v298_v50, %v297_v51 }
 0x12b   : > { %v319_v54 = vsel %vm316_vm6, %v318_v52, 0.0 }
 0x12c   : > { %v331_v55 = vsel %vm320_vm7, %v319_v54, 0.0  ;;  %v321_v56 = vsel %vm320_vm7, %v299_v53, 0.0 }
 0x12d   : > { %332 = vadd.xlane.f32.xlu2 %v331_v55  ;;  %322 = vadd.xlane.f32.xlu0 %v321_v56 }
 0x135   : > { %344 = vadd.xlane.f32.xlu0 %v343_v59 }
 0x1a0   : > { %v323_v60 = vpop.xlane.xlu0 %322  ;;  %v333_v61 = vpop.xlane.xlu2 %332 }
 0x1a1   : > { %v324_v62 = vrot.slane %v323_v60, 4  ;;  %v334_v63 = vrot.slane %v333_v61, 4 }
 0x1a3   : > { %v325_v0 = vadd.f32 %v324_v62, %v323_v60  ;;  %v335_v1 = vadd.f32 %v334_v63, %v333_v61 }
 0x1a5   : > { %v326_v2 = vrot.slane %v325_v0, 2  ;;  %v336_v3 = vrot.slane %v335_v1, 2 }
 0x1a7   : > { %v337_v4 = vadd.f32 %v336_v3, %v335_v1  ;;  %v327_v5 = vadd.f32 %v326_v2, %v325_v0 }
 0x1a8   : > { %v345_v6 = vpop.xlane.xlu0 %344 }
 0x1a9   : > { %v346_v7 = vrot.slane %v345_v6, 4  ;;  %v328_v8 = vrot.slane %v327_v5, 1  ;;  %v338_v10 = vrot.slane %v337_v4, 1 }
 0x1ab   : > { %v347_v11 = vadd.f32 %v346_v7, %v345_v6  ;;  %v329_v12 = vadd.f32 %v328_v8, %v327_v5  ;;  %v339_v13 = vadd.f32 %v338_v10, %v337_v4 }
 0x1ad   : > { %v348_v14 = vrot.slane %v347_v11, 2  ;;  %502 = vpush %v329_v12 }
 0x1ae   : > { %504 = vpush %v339_v13 }
 0x1af   : > { %v349_v15 = vadd.f32 %v348_v14, %v347_v11 }
 0x1b1   : > { %v350_v16 = vrot.slane %v349_v15, 1 }
 0x1b3   : > { %v351_v17 = vadd.f32 %v350_v16, %v349_v15 }
 0x1b5   : > { %506 = vpush %v351_v17 }
 0x1de   : > { %s503_s21 = spop %502 }
 0x1df   : > { %s505_s28 = spop %504  ;;  %v362_v9 = vstv %s503_s21 }
 0x1e0   : > { %v360_v20 = vstv %s505_s28 }
 0x1e6   : > { %s507_s4 = spop %506 }
 0x1e7   : > { %v358_v19 = vstv %s507_s4 }
 0x1e8   : > { %v359_v21 = vsel %vm357_vm8, %v358_v19, 0.0 }
 0x1e9   : > { %v361_v22 = vsel %vm356_vm9, %v360_v20, %v359_v21 }
 0x1ea   : > { %v363_v23 = vsel %vm355_vm10, %v362_v9, %v361_v22 }
 0x1eb   : > { %364 = vst [vmem:[%s227_s29] sm:$0xff] %v363_v23 }
 0x1ec   : > { %606 = shalt.err (!%p603_p5)
}
 0x1ed   : > { %508 = dma.vmem_to_hbm [thread:$0]  (%p721_p4), %s380_s30, 128, %s382_s5, %s366_s15  }
 0x1ee PF: > { %p514_p6 = scmp.ge.s32.totalorder %s657_s17, 2  ;;  %s393_s11 = sand.u32 1, %s637_s12  }
 0x1ef   : > { %s394_s21 = scalar_lea.sflag [#allocation3], %s393_s11 }
 0x1f0   : > { %p511_p7 = pnand %p514_p6, %p728_p8 }
 0x1f2   : > { %p512_p9 = pneg %p511_p7 }
 0x1f4   : > { %632 = dma.done.wait (%p512_p9), %s394_s21, 128  }
 0x1f5   : > { %634 = vsyncadd (%p512_p9), %s394_s21, 4294967168  ;;  %s16_s17 = sadd.s32 1, %s657_s17   ;;  %s806_s12 = smov %s641_s13 }
 0x1f6   : > { %p13_p10 = scmp.ge.s32.totalorder %s16_s17, 4   ;;  %s807_s13 = smov %s645_s14 }
 0x1f7   : > { %s808_s14 = smov %s734_s25  ;;  %s809_s15 = smov %s653_s16 }
 0x1f8   : > { %s810_s16 = smov %s812_s20  ;;  %15 = sbr.rel (!%p13_p10) target bundleno = 4 (0x4), region = 73 }
 0x1fd   :  { %400 = vsyncpa [#allocation3], 1 }
 0x1fe   :  { %402 = vsyncpa [#allocation3 + $0x1], 1 }

</bundles_post_ra>
